<compile_context>
chip_gen: v7x
topology: tpu7x:2x2x1
jax: 0.10.0
libtpu: 0.0.40
codegen_flags: <defaults>
</compile_context>

<pallas_src>
import jax
import jax.numpy as jnp
from jax.experimental import pallas as pl
from jax.experimental.pallas import tpu as pltpu


def _round_up(x, m):
    return ((x + m - 1) // m) * m


def _gate_kernel_select(z_ref, wt_ref, o_ref):
    # z_ref:  (1, TM)            int8   atomic numbers, atoms on the lane axis
    # wt_ref: (nelems, maxelem)  f32    transposed gate table (tiny, whole)
    # o_ref:  (nelems, TM)       out    gate output, lane-dense
    z = z_ref[...].astype(jnp.int32)                 # one upcast; HBM read stays 1 B/atom
    wt = wt_ref[...]                                 # read once per invocation
    nelems, maxelem = wt.shape
    tm = z.shape[-1]

    acc = jnp.zeros((nelems, tm), jnp.float32)
    # Each atom matches exactly one element value -> a chain of selects is
    # exact for ANY weight table: 1 cmp + 1 vsel per e (no cast/mul/add).
    # maxelem is small (< mxu_threshold) so full unroll is cheap.
    for e in range(maxelem):
        acc = jnp.where(z == e, wt[:, e:e + 1], acc)   # (1,TM),(nelems,1) -> (nelems,TM)
    o_ref[...] = acc.astype(o_ref.dtype)


def _gate_kernel_mxu(z_ref, wt_ref, o_ref):
    # Large-table route: exact one-hot on sublanes + MXU matmul.
    # z_ref:  (1, TM) int8; wt_ref: (nelems, maxelem_p) f32; o_ref: (nelems, TM)
    z = z_ref[...].astype(jnp.int32)                                  # (1, TM)
    maxelem_p = wt_ref.shape[1]
    tm = z.shape[-1]
    eid = jax.lax.broadcasted_iota(jnp.int32, (maxelem_p, tm), 0)     # element ids on sublanes
    onehot = (eid == z).astype(jnp.float32)                           # exact 0/1, (maxelem_p, TM)
    o_ref[...] = jnp.dot(wt_ref[...], onehot,
                         preferred_element_type=jnp.float32).astype(o_ref.dtype)


def elemental_gate_pallas(atomic_numbers, gate_weight, *, tile_m=32768,
                          out_dtype=None, channel_major=False, mxu_threshold=16):
    """ElementalGate forward.

    atomic_numbers: (B, N) integer atomic numbers (values < maxelem <= 127).
    gate_weight:    (maxelem, nelems) gate / embedding table.
    channel_major:  if True, return the lane-dense (nelems, B*N) layout
                    directly (no wrapper transpose; fuse into the consumer).
    Returns (B, N, nelems) [default] or (nelems, B*N) [channel_major].
    """
    B, N = atomic_numbers.shape
    maxelem, nelems = gate_weight.shape
    if out_dtype is None:
        out_dtype = gate_weight.dtype
    M = B * N
    Mp = _round_up(M, 128)                       # pad rows to 128 only, not a whole tile

    use_mxu = maxelem >= mxu_threshold

    # Tile: large enough to amortize the ~0.35 us per-grid-step overhead,
    # capped so (a) the MXU one-hot intermediate stays small, (b) the grid
    # keeps >= 2 steps when possible (v7x megacore), (c) tile <= Mp.
    tile = _round_up(min(tile_m, 65536), 128)
    if use_mxu:
        tile = min(tile, 8192)
    if Mp > 128:
        tile = min(tile, _round_up(pl.cdiv(Mp, 2), 128))
    tile = min(tile, Mp)
    grid = pl.cdiv(Mp, tile)                     # partial last block is allowed

    # Narrow (1 B/atom), lane-dense atomic-number row.
    z = atomic_numbers.reshape(M).astype(jnp.int8)
    z = jnp.pad(z, (0, Mp - M)).reshape(1, Mp)

    # Transposed gate table (nelems, maxelem); pad maxelem to 8 for the MXU path.
    wt = gate_weight.astype(jnp.float32).T
    if use_mxu:
        mep = _round_up(maxelem, 8)
        wt = jnp.pad(wt, ((0, 0), (0, mep - maxelem)))
    kernel = _gate_kernel_mxu if use_mxu else _gate_kernel_select

    out_t = pl.pallas_call(
        kernel,
        out_shape=jax.ShapeDtypeStruct((nelems, Mp), out_dtype),
        grid_spec=pl.GridSpec(
            grid=(grid,),
            in_specs=[
                pl.BlockSpec((1, tile), lambda i: (0, i)),          # atomic numbers
                pl.BlockSpec(wt.shape, lambda i: (0, 0)),           # full gate table
            ],
            out_specs=pl.BlockSpec((nelems, tile), lambda i: (0, i)),
        ),
        compiler_params=pltpu.CompilerParams(
            dimension_semantics=("parallel",)),
    )(z, wt)

    if channel_major:
        return out_t[:, :M]                      # lane-dense, no transpose
    # PyTorch-parity layout (costs an XLA transpose of the whole output;
    # prefer channel_major=True + fusing into the consumer when possible).
    return out_t[:, :M].T.reshape(B, N, nelems)


def make_onehot_gate_weight(elements):
    """Deterministic ElementalGate.__init__ with onehot=True."""
    elements = sorted(elements)
    nelems = len(elements)
    maxelem = int(max(elements) + 1)
    w = jnp.zeros((maxelem, nelems), jnp.float32)
    for idx, Z in enumerate(elements):
        w = w.at[Z, idx].set(1.0)
    return w


if __name__ == "__main__":
    key = jax.random.PRNGKey(0)
    k1, k2, k3, k4 = jax.random.split(key, 4)

    # --- test 1: small batch, one-hot gate, select-chain path -------------
    elements = {1, 6, 7, 8}                                   # H, C, N, O
    gate_w = make_onehot_gate_weight(elements)                # (9, 4)
    elem_list = jnp.array(sorted(elements), dtype=jnp.int32)

    B, N = 2, 8
    idx = jax.random.randint(k1, (B, N), 0, len(elem_list))
    atomic_numbers = elem_list[idx]                           # (2, 8) int32

    out = jax.block_until_ready(elemental_gate_pallas(atomic_numbers, gate_w))
    ref = jnp.take(gate_w, atomic_numbers, axis=0)
    assert out.shape == (B, N, len(elements))
    assert jnp.allclose(out, ref), "mismatch vs reference (one-hot gate)"

    # --- test 2: multi-block grid + partial last block + random gate ------
    maxelem, nelems = gate_w.shape
    rand_w = jax.random.normal(k2, (maxelem, nelems), jnp.float32)
    B2, N2 = 3, 100                                           # 300 atoms -> Mp=384, 2 blocks @256
    idx2 = jax.random.randint(k3, (B2, N2), 0, len(elem_list))
    atomic_numbers2 = elem_list[idx2]

    out2 = jax.block_until_ready(
        elemental_gate_pallas(atomic_numbers2, rand_w, tile_m=256))
    ref2 = jnp.take(rand_w, atomic_numbers2, axis=0)
    assert out2.shape == (B2, N2, nelems)
    assert jnp.allclose(out2, ref2), "mismatch vs reference (random gate, multi-block)"

    # --- test 3: large element table -> MXU one-hot path, bf16, channel-major
    elements3 = {1, 6, 7, 8, 16, 26, 29, 47, 79}              # up to Au -> maxelem=80
    gate_w3 = make_onehot_gate_weight(elements3)              # (80, 9)
    elem_list3 = jnp.array(sorted(elements3), dtype=jnp.int32)
    B3, N3 = 2, 96
    idx3 = jax.random.randint(k4, (B3, N3), 0, len(elem_list3))
    atomic_numbers3 = elem_list3[idx3]

    out3 = jax.block_until_ready(
        elemental_gate_pallas(atomic_numbers3, gate_w3,
                              out_dtype=jnp.bfloat16, channel_major=True))
    ref3 = jnp.take(gate_w3, atomic_numbers3, axis=0)         # (B3, N3, 9)
    assert out3.shape == (len(elements3), B3 * N3)
    got3 = out3.astype(jnp.float32).T.reshape(B3, N3, len(elements3))
    assert jnp.allclose(got3, ref3), "mismatch vs reference (MXU one-hot path)"

    print("KERNEL_OK")
</pallas_src>

<mosaic_0001>
module attributes {stable_mosaic.version = 11 : i64} {
  func.func @_gate_kernel_select(%arg0: i32, %arg1: memref<1x128xi8, #tpu.memory_space<vmem>>, %arg2: memref<4x9xf32, #tpu.memory_space<vmem>>, %arg3: memref<4x128xf32, #tpu.memory_space<vmem>>) attributes {dimension_semantics = [#tpu.dimension_semantics<parallel>], iteration_bounds = array<i64: 1>, scalar_prefetch = 0 : i64, scratch_operands = 0 : i64, tpu.core_type = #tpu.core_type<tc>, window_params = [{transform_indices = @transform_0, window_bounds = array<i64: 1, 128>}, {pipeline_mode = #tpu.pipeline_mode<synchronous>, transform_indices = @transform_1, window_bounds = array<i64: 4, 9>}, {transform_indices = @transform_2, window_bounds = array<i64: 4, 128>}]} {
    %c0 = arith.constant 0 : index
    %c0_0 = arith.constant 0 : index
    %0 = vector.load %arg1[%c0, %c0_0] : memref<1x128xi8, #tpu.memory_space<vmem>>, vector<1x128xi8>
    %1 = arith.extsi %0 : vector<1x128xi8> to vector<1x128xi32>
    %c0_1 = arith.constant 0 : index
    %c0_2 = arith.constant 0 : index
    %2 = vector.load %arg2[%c0_1, %c0_2] : memref<4x9xf32, #tpu.memory_space<vmem>>, vector<4x9xf32>
    %cst = arith.constant 0.000000e+00 : f32
    %3 = vector.broadcast %cst : f32 to vector<4x128xf32>
    %c0_i32 = arith.constant 0 : i32
    %4 = vector.broadcast %c0_i32 : i32 to vector<1x128xi32>
    %5 = arith.cmpi eq, %1, %4 : vector<1x128xi32>
    %6 = vector.extract_strided_slice %2 {offsets = [0, 0], sizes = [4, 1], strides = [1, 1]} : vector<4x9xf32> to vector<4x1xf32>
    %7 = vector.shape_cast %5 : vector<1x128xi1> to vector<1x128xi1>
    %8 = vector.broadcast %7 : vector<1x128xi1> to vector<4x128xi1>
    %9 = vector.shape_cast %6 : vector<4x1xf32> to vector<4x1xf32>
    %10 = vector.broadcast %9 : vector<4x1xf32> to vector<4x128xf32>
    %11 = arith.select %8, %10, %3 : vector<4x128xi1>, vector<4x128xf32>
    %c1_i32 = arith.constant 1 : i32
    %12 = vector.broadcast %c1_i32 : i32 to vector<1x128xi32>
    %13 = arith.cmpi eq, %1, %12 : vector<1x128xi32>
    %14 = vector.extract_strided_slice %2 {offsets = [0, 1], sizes = [4, 1], strides = [1, 1]} : vector<4x9xf32> to vector<4x1xf32>
    %15 = vector.shape_cast %13 : vector<1x128xi1> to vector<1x128xi1>
    %16 = vector.broadcast %15 : vector<1x128xi1> to vector<4x128xi1>
    %17 = vector.shape_cast %14 : vector<4x1xf32> to vector<4x1xf32>
    %18 = vector.broadcast %17 : vector<4x1xf32> to vector<4x128xf32>
    %19 = arith.select %16, %18, %11 : vector<4x128xi1>, vector<4x128xf32>
    %c2_i32 = arith.constant 2 : i32
    %20 = vector.broadcast %c2_i32 : i32 to vector<1x128xi32>
    %21 = arith.cmpi eq, %1, %20 : vector<1x128xi32>
    %22 = vector.extract_strided_slice %2 {offsets = [0, 2], sizes = [4, 1], strides = [1, 1]} : vector<4x9xf32> to vector<4x1xf32>
    %23 = vector.shape_cast %21 : vector<1x128xi1> to vector<1x128xi1>
    %24 = vector.broadcast %23 : vector<1x128xi1> to vector<4x128xi1>
    %25 = vector.shape_cast %22 : vector<4x1xf32> to vector<4x1xf32>
    %26 = vector.broadcast %25 : vector<4x1xf32> to vector<4x128xf32>
    %27 = arith.select %24, %26, %19 : vector<4x128xi1>, vector<4x128xf32>
    %c3_i32 = arith.constant 3 : i32
    %28 = vector.broadcast %c3_i32 : i32 to vector<1x128xi32>
    %29 = arith.cmpi eq, %1, %28 : vector<1x128xi32>
    %30 = vector.extract_strided_slice %2 {offsets = [0, 3], sizes = [4, 1], strides = [1, 1]} : vector<4x9xf32> to vector<4x1xf32>
    %31 = vector.shape_cast %29 : vector<1x128xi1> to vector<1x128xi1>
    %32 = vector.broadcast %31 : vector<1x128xi1> to vector<4x128xi1>
    %33 = vector.shape_cast %30 : vector<4x1xf32> to vector<4x1xf32>
    %34 = vector.broadcast %33 : vector<4x1xf32> to vector<4x128xf32>
    %35 = arith.select %32, %34, %27 : vector<4x128xi1>, vector<4x128xf32>
    %c4_i32 = arith.constant 4 : i32
    %36 = vector.broadcast %c4_i32 : i32 to vector<1x128xi32>
    %37 = arith.cmpi eq, %1, %36 : vector<1x128xi32>
    %38 = vector.extract_strided_slice %2 {offsets = [0, 4], sizes = [4, 1], strides = [1, 1]} : vector<4x9xf32> to vector<4x1xf32>
    %39 = vector.shape_cast %37 : vector<1x128xi1> to vector<1x128xi1>
    %40 = vector.broadcast %39 : vector<1x128xi1> to vector<4x128xi1>
    %41 = vector.shape_cast %38 : vector<4x1xf32> to vector<4x1xf32>
    %42 = vector.broadcast %41 : vector<4x1xf32> to vector<4x128xf32>
    %43 = arith.select %40, %42, %35 : vector<4x128xi1>, vector<4x128xf32>
    %c5_i32 = arith.constant 5 : i32
    %44 = vector.broadcast %c5_i32 : i32 to vector<1x128xi32>
    %45 = arith.cmpi eq, %1, %44 : vector<1x128xi32>
    %46 = vector.extract_strided_slice %2 {offsets = [0, 5], sizes = [4, 1], strides = [1, 1]} : vector<4x9xf32> to vector<4x1xf32>
    %47 = vector.shape_cast %45 : vector<1x128xi1> to vector<1x128xi1>
    %48 = vector.broadcast %47 : vector<1x128xi1> to vector<4x128xi1>
    %49 = vector.shape_cast %46 : vector<4x1xf32> to vector<4x1xf32>
    %50 = vector.broadcast %49 : vector<4x1xf32> to vector<4x128xf32>
    %51 = arith.select %48, %50, %43 : vector<4x128xi1>, vector<4x128xf32>
    %c6_i32 = arith.constant 6 : i32
    %52 = vector.broadcast %c6_i32 : i32 to vector<1x128xi32>
    %53 = arith.cmpi eq, %1, %52 : vector<1x128xi32>
    %54 = vector.extract_strided_slice %2 {offsets = [0, 6], sizes = [4, 1], strides = [1, 1]} : vector<4x9xf32> to vector<4x1xf32>
    %55 = vector.shape_cast %53 : vector<1x128xi1> to vector<1x128xi1>
    %56 = vector.broadcast %55 : vector<1x128xi1> to vector<4x128xi1>
    %57 = vector.shape_cast %54 : vector<4x1xf32> to vector<4x1xf32>
    %58 = vector.broadcast %57 : vector<4x1xf32> to vector<4x128xf32>
    %59 = arith.select %56, %58, %51 : vector<4x128xi1>, vector<4x128xf32>
    %c7_i32 = arith.constant 7 : i32
    %60 = vector.broadcast %c7_i32 : i32 to vector<1x128xi32>
    %61 = arith.cmpi eq, %1, %60 : vector<1x128xi32>
    %62 = vector.extract_strided_slice %2 {offsets = [0, 7], sizes = [4, 1], strides = [1, 1]} : vector<4x9xf32> to vector<4x1xf32>
    %63 = vector.shape_cast %61 : vector<1x128xi1> to vector<1x128xi1>
    %64 = vector.broadcast %63 : vector<1x128xi1> to vector<4x128xi1>
    %65 = vector.shape_cast %62 : vector<4x1xf32> to vector<4x1xf32>
    %66 = vector.broadcast %65 : vector<4x1xf32> to vector<4x128xf32>
    %67 = arith.select %64, %66, %59 : vector<4x128xi1>, vector<4x128xf32>
    %c8_i32 = arith.constant 8 : i32
    %68 = vector.broadcast %c8_i32 : i32 to vector<1x128xi32>
    %69 = arith.cmpi eq, %1, %68 : vector<1x128xi32>
    %70 = vector.extract_strided_slice %2 {offsets = [0, 8], sizes = [4, 1], strides = [1, 1]} : vector<4x9xf32> to vector<4x1xf32>
    %71 = vector.shape_cast %69 : vector<1x128xi1> to vector<1x128xi1>
    %72 = vector.broadcast %71 : vector<1x128xi1> to vector<4x128xi1>
    %73 = vector.shape_cast %70 : vector<4x1xf32> to vector<4x1xf32>
    %74 = vector.broadcast %73 : vector<4x1xf32> to vector<4x128xf32>
    %75 = arith.select %72, %74, %67 : vector<4x128xi1>, vector<4x128xf32>
    %c0_3 = arith.constant 0 : index
    %c0_4 = arith.constant 0 : index
    %76 = vector.load %arg3[%c0_3, %c0_4] : memref<4x128xf32, #tpu.memory_space<vmem>>, vector<4x128xf32>
    tpu.vector_store %arg3[%c0_3, %c0_4], %75 {strides = array<i32>} : memref<4x128xf32, #tpu.memory_space<vmem>>, vector<4x128xf32>,
    return
  }
  func.func @transform_0(%arg0: i32) -> (i32, i32) {
    %c0_i32 = arith.constant 0 : i32
    %c0_i32_0 = arith.constant 0 : i32
    return %c0_i32, %arg0 : i32, i32
  }
  func.func @transform_1(%arg0: i32) -> (i32, i32) {
    %c0_i32 = arith.constant 0 : i32
    %c0_i32_0 = arith.constant 0 : i32
    %c0_i32_1 = arith.constant 0 : i32
    return %c0_i32, %c0_i32_0 : i32, i32
  }
  func.func @transform_2(%arg0: i32) -> (i32, i32) {
    %c0_i32 = arith.constant 0 : i32
    %c0_i32_0 = arith.constant 0 : i32
    return %c0_i32, %arg0 : i32, i32
  }
}

</mosaic_0001>

<bundles_post_ra>
// kernel: tpu_custom_call.1
= control target key start
LH: loop header
LB: loop body
LE: loop exit
PB: predicated region body
PF: predicated region fallthrough
CT: control target
= control target key end

     0   :  { %7 = vsyncpa [#allocation3], 0  ;;  %s337_s0 = inlined_call_operand.hbm [shape: s8[1,128], index: 0, kind: input, shape index: {}]   ;;  %s338_s1 = inlined_call_operand.hbm [shape: f32[4,9], index: 1, kind: input, shape index: {}]   ;;  %s339_s2 = inlined_call_operand.hbm [shape: f32[4,128], index: 2, kind: output, shape index: {}]  }
   0x1   :  { %8 = vsyncpa [#allocation6], 0 }
   0x2   :  { %9 = vsyncpa [#allocation4], 0  ;;  %s258_s9 = smov [#allocation2]   ;;  %s259_s11 = smov [#allocation5]  }
   0x3   :  { %s16_s10 = sshll.u32 %s258_s9, 4  ;;  %s26_s12 = sshll.u32 %s259_s11, 4  ;;  %s17_s10 = int_to_ptr.vmem [resolvable:$true] %s16_s10  ;;  %s27_s12 = int_to_ptr.vmem [resolvable:$true] %s26_s12 }
   0x4   :  { %s186_s15 = scalar_lea.hbm %s337_s0, 16 }
   0x5   :  { %p187_p0 = scmp.ne.s32.totalorder %s337_s0, %s186_s15  ;;  %p190_p1 = scmp.lt.u32.totalorder %s186_s15, %s337_s0 }
   0x7   :  { %p192_p2 = pnand %p190_p1, %p187_p0 }
   0x9   :  { %195 = shalt.err (!%p192_p2)
}
   0xa   :  { %s196_s20 = scalar_lea.vmem %s17_s10, 16  ;;  %s200_s21 = scalar_lea.vmem %s17_s10, 32 }
   0xb   :  { %p197_p3 = scmp.ne.s32.totalorder %s17_s10, %s196_s20  ;;  %p201_p4 = scmp.lt.s32.totalorder %s17_s10, %s17_s10 }
   0xc   :  { %p202_p5 = scmp.lt.s32.totalorder %s200_s21, %s196_s20 }
   0xe   :  { %p203_p6 = por %p202_p5, %p201_p4 }
  0x10   :  { %p204_p7 = pnand %p203_p6, %p197_p3 }
  0x12   :  { %207 = shalt.err (!%p204_p7)
}
  0x13   :  { %19 = dma.hbm_to_vmem [thread:$0]  %s337_s0, 16, %s17_s10, [#allocation3]  }
  0x14   :  { %s208_s26 = scalar_lea.hbm %s338_s1, 64 }
  0x15   :  { %p209_p8 = scmp.ne.s32.totalorder %s338_s1, %s208_s26  ;;  %p212_p9 = scmp.lt.u32.totalorder %s208_s26, %s338_s1 }
  0x17   :  { %p214_p10 = pnand %p212_p9, %p209_p8 }
  0x19   :  { %217 = shalt.err (!%p214_p10)
}
  0x1a   :  { %s218_s3 = scalar_lea.vmem %s27_s12, 64  ;;  %p223_p12 = scmp.lt.s32.totalorder %s27_s12, %s27_s12 }
  0x1b   :  { %p219_p11 = scmp.ne.s32.totalorder %s27_s12, %s218_s3  ;;  %p224_p13 = scmp.lt.s32.totalorder %s218_s3, %s218_s3 }
  0x1d   :  { %p225_p0 = por %p224_p13, %p223_p12 }
  0x1f   :  { %p226_p1 = pnand %p225_p0, %p219_p11 }
  0x21   :  { %229 = shalt.err (!%p226_p1)
}
  0x22   :  { %29 = dma.hbm_to_vmem [thread:$0]  %s338_s1, 64, %s27_s12, [#allocation6]  }
  0x23   :  { %252 = dma.done.wait [#allocation3], 16  }
  0x24   :  { %253 = vsyncadd [#allocation3], 4294967280 }
  0x25   :  { %254 = dma.done.wait [#allocation6], 64  }
  0x26   :  { %255 = vsyncadd [#allocation6], 4294967232  ;;  %v260_v0 = vmov 2   ;;  %v261_v1 = vmov 0   ;;  %v38_v2 = vld [vmem:[#allocation5] sm:$0xf]  ;;  %v41_v11 = vlaneseq }
  0x27   :  { %179 = vset.pattern.permute.xlu1 %v260_v0  ;;  %177 = vset.pattern.permute.xlu0 %v261_v1  ;;  %v262_v3 = vmov 3   ;;  %v263_v4 = vmov 1   ;;  %v264_v5 = vmov 4   ;;  %v265_v6 = vmov 5   ;;  %v36_v10 = vld [vmem:[#allocation2] sm:$0x1] }
  0x28   :  { %72 = vperm.xlu1 %179, %v38_v2   ;;  %48 = vperm.xlu0 %177, %v38_v2   ;;  %v266_v7 = vmov 6   ;;  %v267_v8 = vmov 8   ;;  %v268_v9 = vmov 7   ;;  %v37_v12 = vunpack.c.0.s8 %v36_v10  ;;  %s269_s1 = smov [#allocation7]  }
  0x29   :  { %v42_v13 = vshrl.u32 %v41_v11, 7  ;;  %s155_s5 = sshll.u32 %s269_s1, 4  ;;  %s156_s5 = int_to_ptr.vmem [resolvable:$true] %s155_s5 }
  0x2a   :  { %vm39_vm0 = vcmp.eq.s32.totalorder %v37_v12, 0  ;;  %vm52_vm1 = vcmp.eq.s32.totalorder %v37_v12, 1  ;;  %vm64_vm2 = vcmp.eq.s32.totalorder %v37_v12, 2  ;;  %vm76_vm3 = vcmp.eq.s32.totalorder %v37_v12, 3  ;;  %s230_s6 = scalar_lea.vmem %s156_s5, 64  ;;  %p235_p3 = scmp.lt.s32.totalorder %s156_s5, %s156_s5 }
  0x2b   :  { %v43_v14 = vsub.s32 0, %v42_v13  ;;  %v40_v15 = vsel %vm39_vm0, 1, %v261_v1  ;;  %v53_v17 = vsel %vm52_vm1, 1, %v261_v1  ;;  %v65_v20 = vsel %vm64_vm2, 1, %v261_v1  ;;  %p231_p2 = scmp.ne.s32.totalorder %s156_s5, %s230_s6  ;;  %p236_p4 = scmp.lt.s32.totalorder %s230_s6, %s230_s6 }
  0x2c   :  { %180 = vset.pattern.permute.xlu1 %v262_v3  ;;  %178 = vset.pattern.permute.xlu0 %v263_v4  ;;  %vm88_vm5 = vcmp.eq.s32.totalorder %v37_v12, 4  ;;  %v77_v24 = vsel %vm76_vm3, 1, %v261_v1  ;;  %vm100_vm7 = vcmp.eq.s32.totalorder %v37_v12, 5  ;;  %vm112_vm8 = vcmp.eq.s32.totalorder %v37_v12, 6 }
  0x2d   :  { %84 = vperm.xlu1 %180, %v38_v2   ;;  %60 = vperm.xlu0 %178, %v38_v2   ;;  %v44_v16 = vrot.slane %v40_v15, %v43_v14  ;;  %v57_v21 = vrot.slane %v53_v17, %v43_v14  ;;  %v69_v22 = vrot.slane %v65_v20, %v43_v14  ;;  %v89_v27 = vsel %vm88_vm5, 1, %v261_v1  ;;  %p237_p5 = por %p236_p4, %p235_p3 }
  0x2e   :  { %v81_v29 = vrot.slane %v77_v24, %v43_v14  ;;  %vm124_vm10 = vcmp.eq.s32.totalorder %v37_v12, 7  ;;  %v93_v31 = vrot.slane %v89_v27, %v43_v14  ;;  %v101_v32 = vsel %vm100_vm7, 1, %v261_v1 }
  0x2f   :  { %vm45_vm4 = vcmp.eq.s32.totalorder %v44_v16, 1  ;;  %vm58_vm6 = vcmp.eq.s32.totalorder %v57_v21, 1  ;;  %vm315_vm9 = vcmp.eq.s32.totalorder %v69_v22, 1  ;;  %vm136_vm11 = vcmp.eq.s32.totalorder %v37_v12, 8  ;;  %p238_p6 = pnand %p237_p5, %p231_p2 }
  0x30   :  { %v113_v34 = vsel %vm112_vm8, 1, %v261_v1  ;;  %v125_v35 = vsel %vm124_vm10, 1, %v261_v1  ;;  %vm82_vm12 = vcmp.eq.s32.totalorder %v81_v29, 1  ;;  %v105_v37 = vrot.slane %v101_v32, %v43_v14 }
  0x31   :  { %181 = vset.pattern.permute.xlu1 %v264_v5  ;;  %182 = vset.pattern.permute.xlu0 %v265_v6  ;;  %v137_v38 = vsel %vm136_vm11, 1, %v261_v1  ;;  %vm94_vm13 = vcmp.eq.s32.totalorder %v93_v31, 1  ;;  %v117_v39 = vrot.slane %v113_v34, %v43_v14  ;;  %v129_v40 = vrot.slane %v125_v35, %v43_v14 }
  0x32   :  { %96 = vperm.xlu1 %181, %v38_v2   ;;  %108 = vperm.xlu0 %182, %v38_v2   ;;  %v141_v44 = vrot.slane %v137_v38, %v43_v14  ;;  %vm106_vm14 = vcmp.eq.s32.totalorder %v105_v37, 1 }
  0x33   :  { %vm118_vm15 = vcmp.eq.s32.totalorder %v117_v39, 1  ;;  %vm130_vm0 = vcmp.eq.s32.totalorder %v129_v40, 1 }
  0x34   :  { %vm142_vm1 = vcmp.eq.s32.totalorder %v141_v44, 1 }
  0x36   :  { %183 = vset.pattern.permute.xlu1 %v266_v7  ;;  %185 = vset.pattern.permute.xlu0 %v267_v8 }
  0x37   :  { %120 = vperm.xlu1 %183, %v38_v2   ;;  %144 = vperm.xlu0 %185, %v38_v2  }
  0x3b   :  { %184 = vset.pattern.permute.xlu1 %v268_v9 }
  0x3c   :  { %132 = vperm.xlu1 %184, %v38_v2  }
  0xa7   :  { %v73_v18 = vpop.permute.xlu1 %72  ;;  %v49_v19 = vpop.permute.xlu0 %48 }
  0xa8   :  { %v51_v25 = vsel %vm45_vm4, %v49_v19, 0.0 }
  0xac   :  { %v85_v23 = vpop.permute.xlu1 %84  ;;  %v61_v26 = vpop.permute.xlu0 %60 }
  0xad   :  { %v63_v30 = vsel %vm58_vm6, %v61_v26, %v51_v25 }
  0xae   :  { %v75_v36 = vsel %vm315_vm9, %v73_v18, %v63_v30 }
  0xaf   :  { %v87_v41 = vsel %vm82_vm12, %v85_v23, %v75_v36 }
  0xb1   :  { %v97_v33 = vpop.permute.xlu1 %96  ;;  %v109_v42 = vpop.permute.xlu0 %108 }
  0xb2   :  { %v99_v45 = vsel %vm94_vm13, %v97_v33, %v87_v41 }
  0xb3   :  { %v111_v46 = vsel %vm106_vm14, %v109_v42, %v99_v45 }
  0xb6   :  { %v121_v43 = vpop.permute.xlu1 %120  ;;  %v145_v47 = vpop.permute.xlu0 %144 }
  0xb7   :  { %v123_v48 = vsel %vm118_vm15, %v121_v43, %v111_v46 }
  0xbb   :  { %v133_v49 = vpop.permute.xlu1 %132 }
  0xbc   :  { %v135_v50 = vsel %vm130_vm0, %v133_v49, %v123_v48 }
  0xbd   :  { %v147_v51 = vsel %vm142_vm1, %v145_v47, %v135_v50 }
  0xbe   :  { %148 = vst [vmem:[#allocation7] sm:$0xf] %v147_v51 }
  0xbf   :  { %241 = shalt.err (!%p238_p6)
}
  0xc0   :  { %s242_s9 = scalar_lea.hbm %s339_s2, 64 }
  0xc1   :  { %p243_p7 = scmp.ne.s32.totalorder %s339_s2, %s242_s9  ;;  %p246_p8 = scmp.lt.u32.totalorder %s242_s9, %s339_s2 }
  0xc3   :  { %p248_p9 = pnand %p246_p8, %p243_p7 }
  0xc5   :  { %251 = shalt.err (!%p248_p9)
}
  0xc6   :  { %158 = dma.vmem_to_hbm [thread:$0]  %s156_s5, 64, %s339_s2, [#allocation4]  }
  0xc7   :  { %256 = dma.done.wait [#allocation4], 64  }
  0xc8   :  { %257 = vsyncadd [#allocation4], 4294967232 }
  0xc9   :  { %162 = vsyncpa [#allocation3], 1 }
  0xca   :  { %163 = vsyncpa [#allocation6], 1 }
  0xcb   :  { %164 = vsyncpa [#allocation4], 1 }

</bundles_post_ra>
